<compile_context>
chip_gen: v5e
topology: v5e:2x2
jax: 0.10.0
libtpu: 0.0.40
codegen_flags: <defaults>
</compile_context>

<pallas_src>
import functools
import math

import jax
import jax.numpy as jnp
from jax.experimental import pallas as pl
from jax.experimental.pallas import tpu as pltpu


# ----------------------------------------------------------------------------
# Fused Pallas kernel: conv matmul + bias + InstanceNorm(affine) + LeakyReLU
# ----------------------------------------------------------------------------
def _fused_downconv_kernel(patches_ref, w_ref, bias_ref, gamma_ref, beta_ref,
                           o_ref, sum_ref, ssq_ref,
                           *, eps, slope, s_total, n_s):
    si = pl.program_id(1)

    @pl.when(si == 0)
    def _init():
        sum_ref[...] = jnp.zeros_like(sum_ref)
        ssq_ref[...] = jnp.zeros_like(ssq_ref)

    # (Cout, K) @ (K, s_tile) on the MXU, f32 accumulation, lane-dense output.
    acc = jnp.dot(w_ref[...], patches_ref[...],
                  preferred_element_type=jnp.float32) + bias_ref[...]

    # Output block is resident across the (arbitrary) spatial-tile axis;
    # write this tile and update streaming per-channel statistics.
    o_ref[si] = acc
    sum_ref[...] += jnp.sum(acc, axis=-1, keepdims=True)
    ssq_ref[...] += jnp.sum(acc * acc, axis=-1, keepdims=True)

    @pl.when(si == n_s - 1)
    def _finalize():
        inv_n = 1.0 / float(s_total)
        mean = sum_ref[...] * inv_n                         # (Cout, 1)
        var = ssq_ref[...] * inv_n - mean * mean            # biased variance
        scale = jax.lax.rsqrt(var + eps) * gamma_ref[...]   # fold affine weight
        shift = beta_ref[...] - mean * scale                # fold affine bias

        def _norm_tile(i, carry):
            y = o_ref[i] * scale + shift
            o_ref[i] = jnp.where(y >= 0.0, y, slope * y)    # LeakyReLU(0.01)
            return carry

        jax.lax.fori_loop(0, n_s, _norm_tile, 0, unroll=n_s <= 8)


def _choose_s_tile(S, max_tile):
    """Largest spatial tile that is a multiple of 128, divides S and <= max_tile.
    Falls back to the full extent S when S is small or has no such divisor."""
    if S <= max_tile:
        return S
    t = (max_tile // 128) * 128
    while t >= 128:
        if S % t == 0:
            return t
        t -= 128
    return S


# ----------------------------------------------------------------------------
# DownConvLayer forward
# ----------------------------------------------------------------------------
def down_conv_layer(x, params, *, eps=1e-5, negative_slope=0.01,
                    mxu_dtype=jnp.bfloat16, s_tile_max=1024):
    """x: (B, Cin, D, H, W) NCDHW float32 -> (B, Cout, ceil(D/2), ceil(H/2), ceil(W/2))."""
    conv_w = params["conv_w"]          # (Cout, Cin, 3, 3, 3)
    conv_b = params["conv_b"]          # (Cout,)
    gamma = params["in_w"]             # (Cout,)  InstanceNorm affine weight
    beta = params["in_b"]              # (Cout,)  InstanceNorm affine bias

    B, C, D, H, W = x.shape
    Cout = conv_w.shape[0]
    Do, Ho, Wo = (D - 1) // 2 + 1, (H - 1) // 2 + 1, (W - 1) // 2 + 1
    S = Do * Ho * Wo
    K = C * 27

    # ---- im2col (stride 2, pad 1) in (B, K, S) spatial-last layout ----------
    xp = jnp.pad(x, ((0, 0), (0, 0), (1, 1), (1, 1), (1, 1)))
    taps = [
        xp[:, :, kd:kd + 2 * Do:2, kh:kh + 2 * Ho:2, kw:kw + 2 * Wo:2]
        for kd in range(3) for kh in range(3) for kw in range(3)
    ]
    patches = jnp.stack(taps, axis=2).reshape(B, K, S).astype(mxu_dtype)

    w_mat = conv_w.reshape(Cout, K).astype(mxu_dtype)          # (Cout, C*27)
    bias2d = conv_b.reshape(Cout, 1).astype(jnp.float32)
    gamma2d = gamma.reshape(Cout, 1).astype(jnp.float32)
    beta2d = beta.reshape(Cout, 1).astype(jnp.float32)

    s_tile = _choose_s_tile(S, s_tile_max)
    n_s = S // s_tile

    kernel = functools.partial(_fused_downconv_kernel, eps=eps,
                               slope=negative_slope, s_total=S, n_s=n_s)

    out = pl.pallas_call(
        kernel,
        out_shape=jax.ShapeDtypeStruct((B, n_s, Cout, s_tile), jnp.float32),
        grid_spec=pltpu.PrefetchScalarGridSpec(
            num_scalar_prefetch=0,
            grid=(B, n_s),
            in_specs=[
                # patches: tiled along the (lane-dense) spatial axis
                pl.BlockSpec((None, K, s_tile), lambda bi, si: (bi, 0, si)),
                # small weights / per-channel vectors: resident (constant index map)
                pl.BlockSpec((Cout, K), lambda bi, si: (0, 0)),
                pl.BlockSpec((Cout, 1), lambda bi, si: (0, 0)),
                pl.BlockSpec((Cout, 1), lambda bi, si: (0, 0)),
                pl.BlockSpec((Cout, 1), lambda bi, si: (0, 0)),
            ],
            # full per-batch output block stays resident across the spatial axis
            out_specs=pl.BlockSpec((None, n_s, Cout, s_tile),
                                   lambda bi, si: (bi, 0, 0, 0)),
            scratch_shapes=[
                pltpu.VMEM((Cout, 1), jnp.float32),   # running per-channel sum
                pltpu.VMEM((Cout, 1), jnp.float32),   # running per-channel sum of squares
            ],
        ),
        compiler_params=pltpu.CompilerParams(
            dimension_semantics=("parallel", "arbitrary"),
            vmem_limit_bytes=48 * 1024 * 1024,
        ),
    )(patches, w_mat, bias2d, gamma2d, beta2d)

    # (B, n_s, Cout, s_tile) -> (B, Cout, S) -> NCDHW
    return out.transpose(0, 2, 1, 3).reshape(B, Cout, Do, Ho, Wo)


# ----------------------------------------------------------------------------
# Pure-XLA reference (for a numerical self-check) and parameter init
# ----------------------------------------------------------------------------
def _reference(x, params, eps=1e-5, slope=0.01):
    w, b = params["conv_w"], params["conv_b"]
    gamma, beta = params["in_w"], params["in_b"]
    out = jax.lax.conv_general_dilated(
        x, w, window_strides=(2, 2, 2), padding=((1, 1), (1, 1), (1, 1)),
        dimension_numbers=("NCDHW", "OIDHW", "NCDHW"),
        precision=jax.lax.Precision.HIGHEST)
    out = out + b.reshape(1, -1, 1, 1, 1)
    mean = out.mean(axis=(2, 3, 4), keepdims=True)
    var = ((out - mean) ** 2).mean(axis=(2, 3, 4), keepdims=True)
    y = (out - mean) * jax.lax.rsqrt(var + eps)
    y = y * gamma.reshape(1, -1, 1, 1, 1) + beta.reshape(1, -1, 1, 1, 1)
    return jnp.where(y >= 0.0, y, slope * y)


def init_params(key, in_channels, out_channels):
    k1, k2, k3, k4 = jax.random.split(key, 4)
    fan_in = in_channels * 27
    bound = 1.0 / math.sqrt(fan_in)
    return {
        "conv_w": jax.random.uniform(k1, (out_channels, in_channels, 3, 3, 3),
                                     jnp.float32, -bound, bound),
        "conv_b": jax.random.uniform(k2, (out_channels,), jnp.float32, -bound, bound),
        # PyTorch InstanceNorm3d(affine=True) initializes weight=1, bias=0; we
        # perturb them slightly so the affine path is actually exercised below.
        "in_w": 1.0 + 0.1 * jax.random.normal(k3, (out_channels,), jnp.float32),
        "in_b": 0.1 * jax.random.normal(k4, (out_channels,), jnp.float32),
    }


# ----------------------------------------------------------------------------
if __name__ == "__main__":
    B, Cin, Cout = 2, 4, 8
    D = H = W = 16                      # -> output spatial (8, 8, 8), S = 512

    key = jax.random.PRNGKey(0)
    kx, kp = jax.random.split(key)
    x = jax.random.normal(kx, (B, Cin, D, H, W), jnp.float32)
    params = init_params(kp, Cin, Cout)

    # s_tile_max=256 -> 2 spatial tiles per batch: exercises the streaming-stats
    # accumulator and the resident-output-block path (grid = (2, 2)).
    fwd = jax.jit(functools.partial(down_conv_layer, s_tile_max=256))
    out = jax.block_until_ready(fwd(x, params))

    ref = jax.block_until_ready(jax.jit(_reference)(x, params))

    assert out.shape == (B, Cout, D // 2, H // 2, W // 2), out.shape
    assert bool(jnp.all(jnp.isfinite(out)))
    max_err = float(jnp.max(jnp.abs(out - ref)))
    # bf16 MXU operands with f32 accumulation and f32 norm math: loose tolerance.
    assert max_err < 0.2, f"mismatch vs XLA reference: {max_err}"
    print("KERNEL_OK")
</pallas_src>

<mosaic_0001>
module attributes {stable_mosaic.version = 11 : i64} {
  func.func @_fused_downconv_kernel(%arg0: i32, %arg1: i32, %arg2: memref<1x108x256xbf16, #tpu.memory_space<vmem>>, %arg3: memref<8x108xbf16, #tpu.memory_space<vmem>>, %arg4: memref<8x1xf32, #tpu.memory_space<vmem>>, %arg5: memref<8x1xf32, #tpu.memory_space<vmem>>, %arg6: memref<8x1xf32, #tpu.memory_space<vmem>>, %arg7: memref<1x2x8x256xf32, #tpu.memory_space<vmem>>, %arg8: memref<8x1xf32, #tpu.memory_space<vmem>>, %arg9: memref<8x1xf32, #tpu.memory_space<vmem>>) attributes {dimension_semantics = [#tpu.dimension_semantics<parallel>, #tpu.dimension_semantics<arbitrary>], iteration_bounds = array<i64: 2, 2>, scalar_prefetch = 0 : i64, scratch_operands = 2 : i64, tpu.core_type = #tpu.core_type<tc>, window_params = [{transform_indices = @transform_0, window_bounds = array<i64: 1, 108, 256>}, {pipeline_mode = #tpu.pipeline_mode<synchronous>, transform_indices = @transform_1, window_bounds = array<i64: 8, 108>}, {pipeline_mode = #tpu.pipeline_mode<synchronous>, transform_indices = @transform_2, window_bounds = array<i64: 8, 1>}, {pipeline_mode = #tpu.pipeline_mode<synchronous>, transform_indices = @transform_3, window_bounds = array<i64: 8, 1>}, {pipeline_mode = #tpu.pipeline_mode<synchronous>, transform_indices = @transform_4, window_bounds = array<i64: 8, 1>}, {transform_indices = @transform_5, window_bounds = array<i64: 1, 2, 8, 256>}]} {
    %c0_i32 = arith.constant 0 : i32
    %0 = arith.cmpi eq, %arg1, %c0_i32 : i32
    %1 = arith.extui %0 : i1 to i32
    %c0_i32_0 = arith.constant 0 : i32
    %2 = arith.cmpi ne, %1, %c0_i32_0 : i32
    scf.if %2 {
      %cst_21 = arith.constant 0.000000e+00 : f32
      %28 = vector.broadcast %cst_21 : f32 to vector<8x1xf32>
      %c0_22 = arith.constant 0 : index
      %c0_23 = arith.constant 0 : index
      %29 = vector.load %arg8[%c0_22, %c0_23] : memref<8x1xf32, #tpu.memory_space<vmem>>, vector<8x1xf32>
      tpu.vector_store %arg8[%c0_22, %c0_23], %28 {strides = array<i32>} : memref<8x1xf32, #tpu.memory_space<vmem>>, vector<8x1xf32>,
      %cst_24 = arith.constant 0.000000e+00 : f32
      %30 = vector.broadcast %cst_24 : f32 to vector<8x1xf32>
      %c0_25 = arith.constant 0 : index
      %c0_26 = arith.constant 0 : index
      %31 = vector.load %arg9[%c0_25, %c0_26] : memref<8x1xf32, #tpu.memory_space<vmem>>, vector<8x1xf32>
      tpu.vector_store %arg9[%c0_25, %c0_26], %30 {strides = array<i32>} : memref<8x1xf32, #tpu.memory_space<vmem>>, vector<8x1xf32>,
    } else {
    }
    %c0 = arith.constant 0 : index
    %c0_1 = arith.constant 0 : index
    %3 = vector.load %arg3[%c0, %c0_1] : memref<8x108xbf16, #tpu.memory_space<vmem>>, vector<8x108xbf16>
    %c0_2 = arith.constant 0 : index
    %c0_3 = arith.constant 0 : index
    %c0_4 = arith.constant 0 : index
    %4 = vector.load %arg2[%c0_2, %c0_3, %c0_4] : memref<1x108x256xbf16, #tpu.memory_space<vmem>>, vector<1x108x256xbf16>
    %5 = vector.shape_cast %4 : vector<1x108x256xbf16> to vector<108x256xbf16>
    %cst = arith.constant dense<0.000000e+00> : vector<8x256xf32>
    %6 = tpu.matmul %3, %5, %cst {dimension_numbers = #tpu.dot_dimension_numbers<[1], [0], [0], [1], [0, 0, 1, 1], [], []>} : vector<8x108xbf16>, vector<108x256xbf16>, vector<8x256xf32> -> vector<8x256xf32>
    %c0_5 = arith.constant 0 : index
    %c0_6 = arith.constant 0 : index
    %7 = vector.load %arg4[%c0_5, %c0_6] : memref<8x1xf32, #tpu.memory_space<vmem>>, vector<8x1xf32>
    %8 = vector.broadcast %7 : vector<8x1xf32> to vector<8x256xf32>
    %9 = arith.addf %6, %8 : vector<8x256xf32>
    %c0_7 = arith.constant 0 : index
    %10 = arith.index_cast %arg1 : i32 to index
    %c0_8 = arith.constant 0 : index
    %c0_9 = arith.constant 0 : index
    %11 = vector.load %arg7[%c0_7, %10, %c0_8, %c0_9] : memref<1x2x8x256xf32, #tpu.memory_space<vmem>>, vector<1x1x8x256xf32>
    %12 = vector.shape_cast %11 : vector<1x1x8x256xf32> to vector<8x256xf32>
    %13 = vector.shape_cast %9 : vector<8x256xf32> to vector<1x1x8x256xf32>
    tpu.vector_store %arg7[%c0_7, %10, %c0_8, %c0_9], %13 {strides = array<i32>} : memref<1x2x8x256xf32, #tpu.memory_space<vmem>>, vector<1x1x8x256xf32>,
    %c0_10 = arith.constant 0 : index
    %c0_11 = arith.constant 0 : index
    %14 = vector.load %arg8[%c0_10, %c0_11] : memref<8x1xf32, #tpu.memory_space<vmem>>, vector<8x1xf32>
    %cst_12 = arith.constant dense<0.000000e+00> : vector<8xf32>
    %15 = vector.multi_reduction <add>, %9, %cst_12 [1] : vector<8x256xf32> to vector<8xf32>
    %16 = vector.shape_cast %15 : vector<8xf32> to vector<8x1xf32>
    %17 = arith.addf %14, %16 : vector<8x1xf32>
    %c0_13 = arith.constant 0 : index
    %c0_14 = arith.constant 0 : index
    %18 = vector.load %arg8[%c0_13, %c0_14] : memref<8x1xf32, #tpu.memory_space<vmem>>, vector<8x1xf32>
    tpu.vector_store %arg8[%c0_13, %c0_14], %17 {strides = array<i32>} : memref<8x1xf32, #tpu.memory_space<vmem>>, vector<8x1xf32>,
    %c0_15 = arith.constant 0 : index
    %c0_16 = arith.constant 0 : index
    %19 = vector.load %arg9[%c0_15, %c0_16] : memref<8x1xf32, #tpu.memory_space<vmem>>, vector<8x1xf32>
    %20 = arith.mulf %9, %9 : vector<8x256xf32>
    %cst_17 = arith.constant dense<0.000000e+00> : vector<8xf32>
    %21 = vector.multi_reduction <add>, %20, %cst_17 [1] : vector<8x256xf32> to vector<8xf32>
    %22 = vector.shape_cast %21 : vector<8xf32> to vector<8x1xf32>
    %23 = arith.addf %19, %22 : vector<8x1xf32>
    %c0_18 = arith.constant 0 : index
    %c0_19 = arith.constant 0 : index
    %24 = vector.load %arg9[%c0_18, %c0_19] : memref<8x1xf32, #tpu.memory_space<vmem>>, vector<8x1xf32>
    tpu.vector_store %arg9[%c0_18, %c0_19], %23 {strides = array<i32>} : memref<8x1xf32, #tpu.memory_space<vmem>>, vector<8x1xf32>,
    %c1_i32 = arith.constant 1 : i32
    %25 = arith.cmpi eq, %arg1, %c1_i32 : i32
    %26 = arith.extui %25 : i1 to i32
    %c0_i32_20 = arith.constant 0 : i32
    %27 = arith.cmpi ne, %26, %c0_i32_20 : i32
    scf.if %27 {
      %c0_21 = arith.constant 0 : index
      %c0_22 = arith.constant 0 : index
      %28 = vector.load %arg8[%c0_21, %c0_22] : memref<8x1xf32, #tpu.memory_space<vmem>>, vector<8x1xf32>
      %cst_23 = arith.constant 0.001953125 : f32
      %29 = vector.broadcast %cst_23 : f32 to vector<8x1xf32>
      %30 = arith.mulf %28, %29 : vector<8x1xf32>
      %c0_24 = arith.constant 0 : index
      %c0_25 = arith.constant 0 : index
      %31 = vector.load %arg9[%c0_24, %c0_25] : memref<8x1xf32, #tpu.memory_space<vmem>>, vector<8x1xf32>
      %cst_26 = arith.constant 0.001953125 : f32
      %32 = vector.broadcast %cst_26 : f32 to vector<8x1xf32>
      %33 = arith.mulf %31, %32 : vector<8x1xf32>
      %34 = arith.mulf %30, %30 : vector<8x1xf32>
      %35 = arith.subf %33, %34 : vector<8x1xf32>
      %cst_27 = arith.constant 9.99999974E-6 : f32
      %36 = vector.broadcast %cst_27 : f32 to vector<8x1xf32>
      %37 = arith.addf %35, %36 : vector<8x1xf32>
      %38 = math.rsqrt %37 : vector<8x1xf32>
      %c0_28 = arith.constant 0 : index
      %c0_29 = arith.constant 0 : index
      %39 = vector.load %arg5[%c0_28, %c0_29] : memref<8x1xf32, #tpu.memory_space<vmem>>, vector<8x1xf32>
      %40 = arith.mulf %38, %39 : vector<8x1xf32>
      %c0_30 = arith.constant 0 : index
      %c0_31 = arith.constant 0 : index
      %41 = vector.load %arg6[%c0_30, %c0_31] : memref<8x1xf32, #tpu.memory_space<vmem>>, vector<8x1xf32>
      %42 = arith.mulf %30, %40 : vector<8x1xf32>
      %43 = arith.subf %41, %42 : vector<8x1xf32>
      %c0_i32_32 = arith.constant 0 : i32
      %c0_33 = arith.constant 0 : index
      %44 = arith.index_cast %c0_i32_32 : i32 to index
      %c0_34 = arith.constant 0 : index
      %c0_35 = arith.constant 0 : index
      %45 = vector.load %arg7[%c0_33, %44, %c0_34, %c0_35] : memref<1x2x8x256xf32, #tpu.memory_space<vmem>>, vector<1x1x8x256xf32>
      %46 = vector.shape_cast %45 : vector<1x1x8x256xf32> to vector<8x256xf32>
      %47 = vector.broadcast %40 : vector<8x1xf32> to vector<8x256xf32>
      %48 = arith.mulf %46, %47 : vector<8x256xf32>
      %49 = vector.broadcast %43 : vector<8x1xf32> to vector<8x256xf32>
      %50 = arith.addf %48, %49 : vector<8x256xf32>
      %cst_36 = arith.constant 0.000000e+00 : f32
      %51 = vector.broadcast %cst_36 : f32 to vector<8x256xf32>
      %52 = arith.cmpf oge, %50, %51 : vector<8x256xf32>
      %cst_37 = arith.constant 0.00999999977 : f32
      %53 = vector.broadcast %cst_37 : f32 to vector<8x256xf32>
      %54 = arith.mulf %53, %50 : vector<8x256xf32>
      %55 = arith.select %52, %50, %54 : vector<8x256xi1>, vector<8x256xf32>
      %c0_38 = arith.constant 0 : index
      %56 = arith.index_cast %c0_i32_32 : i32 to index
      %c0_39 = arith.constant 0 : index
      %c0_40 = arith.constant 0 : index
      %57 = vector.load %arg7[%c0_38, %56, %c0_39, %c0_40] : memref<1x2x8x256xf32, #tpu.memory_space<vmem>>, vector<1x1x8x256xf32>
      %58 = vector.shape_cast %57 : vector<1x1x8x256xf32> to vector<8x256xf32>
      %59 = vector.shape_cast %55 : vector<8x256xf32> to vector<1x1x8x256xf32>
      tpu.vector_store %arg7[%c0_38, %56, %c0_39, %c0_40], %59 {strides = array<i32>} : memref<1x2x8x256xf32, #tpu.memory_space<vmem>>, vector<1x1x8x256xf32>,
      %c1_i32_41 = arith.constant 1 : i32
      %c0_42 = arith.constant 0 : index
      %60 = arith.index_cast %c1_i32_41 : i32 to index
      %c0_43 = arith.constant 0 : index
      %c0_44 = arith.constant 0 : index
      %61 = vector.load %arg7[%c0_42, %60, %c0_43, %c0_44] : memref<1x2x8x256xf32, #tpu.memory_space<vmem>>, vector<1x1x8x256xf32>
      %62 = vector.shape_cast %61 : vector<1x1x8x256xf32> to vector<8x256xf32>
      %63 = vector.broadcast %40 : vector<8x1xf32> to vector<8x256xf32>
      %64 = arith.mulf %62, %63 : vector<8x256xf32>
      %65 = vector.broadcast %43 : vector<8x1xf32> to vector<8x256xf32>
      %66 = arith.addf %64, %65 : vector<8x256xf32>
      %cst_45 = arith.constant 0.000000e+00 : f32
      %67 = vector.broadcast %cst_45 : f32 to vector<8x256xf32>
      %68 = arith.cmpf oge, %66, %67 : vector<8x256xf32>
      %cst_46 = arith.constant 0.00999999977 : f32
      %69 = vector.broadcast %cst_46 : f32 to vector<8x256xf32>
      %70 = arith.mulf %69, %66 : vector<8x256xf32>
      %71 = arith.select %68, %66, %70 : vector<8x256xi1>, vector<8x256xf32>
      %c0_47 = arith.constant 0 : index
      %72 = arith.index_cast %c1_i32_41 : i32 to index
      %c0_48 = arith.constant 0 : index
      %c0_49 = arith.constant 0 : index
      %73 = vector.load %arg7[%c0_47, %72, %c0_48, %c0_49] : memref<1x2x8x256xf32, #tpu.memory_space<vmem>>, vector<1x1x8x256xf32>
      %74 = vector.shape_cast %73 : vector<1x1x8x256xf32> to vector<8x256xf32>
      %75 = vector.shape_cast %71 : vector<8x256xf32> to vector<1x1x8x256xf32>
      tpu.vector_store %arg7[%c0_47, %72, %c0_48, %c0_49], %75 {strides = array<i32>} : memref<1x2x8x256xf32, #tpu.memory_space<vmem>>, vector<1x1x8x256xf32>,
      %c2_i32 = arith.constant 2 : i32
    } else {
    }
    return
  }
  func.func @transform_0(%arg0: i32, %arg1: i32) -> (i32, i32, i32) {
    %c0_i32 = arith.constant 0 : i32
    %c0_i32_0 = arith.constant 0 : i32
    return %arg0, %c0_i32, %arg1 : i32, i32, i32
  }
  func.func @transform_1(%arg0: i32, %arg1: i32) -> (i32, i32) {
    %c0_i32 = arith.constant 0 : i32
    %c0_i32_0 = arith.constant 0 : i32
    %c0_i32_1 = arith.constant 0 : i32
    return %c0_i32, %c0_i32_0 : i32, i32
  }
  func.func @transform_2(%arg0: i32, %arg1: i32) -> (i32, i32) {
    %c0_i32 = arith.constant 0 : i32
    %c0_i32_0 = arith.constant 0 : i32
    %c0_i32_1 = arith.constant 0 : i32
    return %c0_i32, %c0_i32_0 : i32, i32
  }
  func.func @transform_3(%arg0: i32, %arg1: i32) -> (i32, i32) {
    %c0_i32 = arith.constant 0 : i32
    %c0_i32_0 = arith.constant 0 : i32
    %c0_i32_1 = arith.constant 0 : i32
    return %c0_i32, %c0_i32_0 : i32, i32
  }
  func.func @transform_4(%arg0: i32, %arg1: i32) -> (i32, i32) {
    %c0_i32 = arith.constant 0 : i32
    %c0_i32_0 = arith.constant 0 : i32
    %c0_i32_1 = arith.constant 0 : i32
    return %c0_i32, %c0_i32_0 : i32, i32
  }
  func.func @transform_5(%arg0: i32, %arg1: i32) -> (i32, i32, i32, i32) {
    %c0_i32 = arith.constant 0 : i32
    %c0_i32_0 = arith.constant 0 : i32
    %c0_i32_1 = arith.constant 0 : i32
    %c0_i32_2 = arith.constant 0 : i32
    return %arg0, %c0_i32, %c0_i32_0, %c0_i32_1 : i32, i32, i32, i32
  }
}

</mosaic_0001>

<bundles_post_ra>
// kernel: down_conv_layer.1
= control target key start
LH: loop header
LB: loop body
LE: loop exit
PB: predicated region body
PF: predicated region fallthrough
CT: control target
= control target key end

     0   :  { %s874_s18 = smov 0   ;;  %s876_s19 = smov 0   ;;  %s1019_s0 = inlined_call_operand.vmem [shape: bf16[2,108,512], index: 0, kind: input, shape index: {}]   ;;  %s1020_s1 = inlined_call_operand.vmem [shape: bf16[8,108], index: 1, kind: input, shape index: {}]   ;;  %s1021_s2 = inlined_call_operand.vmem [shape: f32[8,1], index: 2, kind: input, shape index: {}]   ;;  %s1022_s3 = inlined_call_operand.vmem [shape: f32[8,1], index: 3, kind: input, shape index: {}]   ;;  %s1023_s4 = inlined_call_operand.vmem [shape: f32[8,1], index: 4, kind: input, shape index: {}]   ;;  %s1024_s5 = inlined_call_operand.vmem [shape: f32[2,2,8,256], index: 5, kind: output, shape index: {}]  }
   0x1   :  { %s878_s20 = smov 0   ;;  %s880_s21 = smov 0  }
   0x2   :  { %s882_s22 = smov 0   ;;  %s884_s23 = smov 0  }
   0x3   :  { %s886_s24 = smov 0  }
   0x4 LB: > { %s24_s25 = sadd.s32 1, %s831_s22  ;;  %s27_s26 = sadd.s32 1, %s835_s23  ;;  %s839_s24 = sphi %s886_s24, %s15_s24   ;;  %s835_s23 = sphi %s884_s23, %s1030_s23   ;;  %s831_s22 = sphi %s882_s22, %s1029_s22   ;;  %s827_s21 = sphi %s880_s21, %s1028_s21   ;;  %s823_s20 = sphi %s878_s20, %s1027_s20   ;;  %s819_s19 = sphi %s876_s19, %s1026_s19   ;;  %s815_s18 = sphi %s874_s18, %s1025_s18  }
   0x5   : > { %p25_p0 = scmp.ge.s32.totalorder %s24_s25, 2  ;;  %p43_p1 = scmp.ne.s32.totalorder %s819_s19, %s815_s18 }
   0x6   : > { %p44_p2 = scmp.eq.s32.totalorder %s839_s24, 0  ;;  %s36_s30 = sadd.s32 1, %s819_s19 }
   0x7   : > { %s1032_s25 = smov (%p25_p0, %s24_s25), 0  ;;  %s1034_s26 = smov (!%p25_p0, %s27_s26), %s835_s23 }
   0x8   : > { %p45_p3 = por %p44_p2, %p43_p1  ;;  %p29_p4 = scmp.ge.s32.totalorder %s1034_s26, 2 }
   0x9   : > { %s32_s27 = ssub.s32 %s831_s22, %s1032_s25  ;;  %p629_p6 = scmp.ge.s32.totalorder %s839_s24, 4 }
   0xa   : > { %s1036_s26 = smov (%p29_p4, %s1034_s26), 0 }
   0xb   : > { %s31_s28 = ssub.s32 %s835_s23, %s1036_s26  ;;  %191 = sbr.rel (%p629_p6) target bundleno = 38 (0x26), region = 32 }
   0xc   : > { %s33_s29 = sor.u32 %s32_s27, %s31_s28 }
   0xd   : > { %p34_p5 = scmp.eq.s32.totalorder %s33_s29, 0 }
   0xf   : > { %s925_s6 = scalar_select %p34_p5, %s819_s19, %s36_s30  }
  0x10   : > { %194 = sbr.rel (!%p45_p3) target bundleno = 38 (0x26), region = 36  ;;  %s196_s7 = sand.u32 (%p45_p3), 1, %s819_s19  }
  0x11   : > { %s719_s8 = smul.u32 (%p45_p3), 112, %s196_s7  ;;  %s630_s9 = sshll.u32 (%p45_p3), %s831_s22, 1 }
  0x12   : > { %s720_s10 = smul.u32 (%p45_p3), 56, %s835_s23 }
  0x13   : > { %s198_s16 = scalar_lea.vmem (%p45_p3), [#allocation4], %s719_s8 }
  0x14   : > { %s201_s11 = sadd.s32 (%p45_p3), %s720_s10, %s630_s9 }
  0x15   : > { %s631_s12 = sshll.u32 %s201_s11, 2 }
  0x16   : > { %s203_s15 = scalar_lea.vmem %s1019_s0, %s631_s12 }
  0x17   : > { %v258_v0 = vld [vmem:[%s203_s15] sm:$0xff]  ;;  %v260_v1 = vld [vmem:[%s203_s15 + $0x10] sm:$0xff] }
  0x18   : > { %v262_v2 = vld [vmem:[%s203_s15 + $0x20] sm:$0xff]  ;;  %259 = vst [vmem:[%s198_s16] sm:$0xff] %v258_v0  ;;  %v264_v3 = vld [vmem:[%s203_s15 + $0x30] sm:$0xff] }
  0x19   : > { %261 = vst [vmem:[%s198_s16 + $0x8] sm:$0xff] %v260_v1  ;;  %v266_v4 = vld [vmem:[%s203_s15 + $0x40] sm:$0xff]  ;;  %v268_v5 = vld [vmem:[%s203_s15 + $0x50] sm:$0xff] }
  0x1a   : > { %263 = vst [vmem:[%s198_s16 + $0x10] sm:$0xff] %v262_v2  ;;  %v270_v6 = vld [vmem:[%s203_s15 + $0x60] sm:$0xff]  ;;  %v272_v7 = vld [vmem:[%s203_s15 + $0x70] sm:$0xff] }
  0x1b   : > { %265 = vst [vmem:[%s198_s16 + $0x18] sm:$0xff] %v264_v3  ;;  %v274_v8 = vld [vmem:[%s203_s15 + $0x80] sm:$0xff]  ;;  %v276_v9 = vld [vmem:[%s203_s15 + $0x90] sm:$0xff] }
  0x1c   : > { %267 = vst [vmem:[%s198_s16 + $0x20] sm:$0xff] %v266_v4  ;;  %v278_v10 = vld [vmem:[%s203_s15 + $0xa0] sm:$0xff]  ;;  %v280_v11 = vld [vmem:[%s203_s15 + $0xb0] sm:$0xff] }
  0x1d   : > { %269 = vst [vmem:[%s198_s16 + $0x28] sm:$0xff] %v268_v5  ;;  %v282_v12 = vld [vmem:[%s203_s15 + $0xc0] sm:$0xff]  ;;  %v284_v13 = vld [vmem:[%s203_s15 + $0xd0] sm:$0xff] }
  0x1e   : > { %271 = vst [vmem:[%s198_s16 + $0x30] sm:$0xff] %v270_v6 }
  0x1f   : > { %273 = vst [vmem:[%s198_s16 + $0x38] sm:$0xff] %v272_v7 }
  0x20   : > { %275 = vst [vmem:[%s198_s16 + $0x40] sm:$0xff] %v274_v8 }
  0x21   : > { %277 = vst [vmem:[%s198_s16 + $0x48] sm:$0xff] %v276_v9 }
  0x22   : > { %279 = vst [vmem:[%s198_s16 + $0x50] sm:$0xff] %v278_v10 }
  0x23   : > { %281 = vst [vmem:[%s198_s16 + $0x58] sm:$0xff] %v280_v11 }
  0x24   : > { %283 = vst [vmem:[%s198_s16 + $0x60] sm:$0xff] %v282_v12 }
  0x25   : > { %285 = vst [vmem:[%s198_s16 + $0x68] sm:$0xff] %v284_v13 }
  0x26 PF: > { %p632_p7 = scmp.ge.s32.totalorder %s839_s24, 1  ;;  %p290_p8 = scmp.lt.s32.totalorder %s839_s24, 5 }
  0x28   : > { %p291_p9 = pnand %p632_p7, %p290_p8 }
  0x29   : > { %s297_s17 = sand.u32 (!%p291_p9), 1, %s815_s18   ;;  %p325_p10 = scmp.lt.s32.totalorder (!%p291_p9), %s827_s21, 1 }
  0x2a   : > { %294 = sbr.rel (%p291_p9) target bundleno = 503 (0x1f7), region = 74  ;;  %p635_p11 = scmp.ne.s32.totalorder (!%p291_p9), %s823_s20, 0 }
  0x2b   : > { %s721_s27 = smul.u32 (!%p291_p9), 112, %s297_s17 }
  0x2d   : > { %s944_s8 = scalar_lea.vmem (!%p291_p9), [#allocation4], %s721_s27 }
  0x2f   : > { %s1038_s21 = smov (!%p325_p10, %s827_s21), 1  ;;  %334 = sbr.rel (%p635_p11) target bundleno = 55 (0x37), region = 82 }
  0x30   : > { %s703_s28 = sshll.u32 %s1038_s21, 5 }
  0x31   : > { %s942_s7 = scalar_lea.vmem %s1024_s5, %s703_s28 }
  0x34   : > { %vm335_vm0 = vcmask 7168   ;;  %v841_v14 = vmov 0.0  }
  0x35   : > { %336 = vst.msk [vmem:[#allocation2] sm:$0xff] %vm335_vm0, %v841_v14 }
  0x36   : > { %337 = vst.msk [vmem:[#allocation3] sm:$0xff] %vm335_vm0, %v841_v14 }
  0x37 PF: > { %v686_v15 = vld [vmem:[%s944_s8 + $0x60] sm:$0xf]  ;;  %v717_v16 = vld [vmem:[%s944_s8 + $0x64] sm:$0x30]  ;;  %vm431_vm1 = vcmask 1045504   ;;  %v842_v28 = vmov 0  }
  0x38   : > { %v687_v17 = vor.u32 %v717_v16, %v686_v15  ;;  %v716_v18 = vld [vmem:[%s944_s8 + $0x64] sm:$0xf]  ;;  %v688_v19 = vld [vmem:[%s944_s8 + $0x68] sm:$0x30]  ;;  %v678_v20 = vld [vmem:[%s944_s8 + $0x50] sm:$0xf]  ;;  %781 = vset.pattern.permute.xlu0 %v842_v28 }
  0x39   : > { %v691_v21 = vor.u32 %v716_v18, %v688_v19  ;;  %v715_v22 = vld [vmem:[%s944_s8 + $0x54] sm:$0xf0]  ;;  %v714_v23 = vld [vmem:[%s944_s8 + $0x54] sm:$0xf]  ;;  %v680_v24 = vld [vmem:[%s944_s8 + $0x58] sm:$0xf0] }
  0x3a   : > { %v433_v25 = vsel %vm431_vm1, %v687_v17, 0  ;;  %v679_v27 = vor.u32 %v715_v22, %v678_v20  ;;  %v353_v29 = vld [vmem:[%s1021_s2] sm:$0xff]  ;;  %v683_v30 = vor.u32 %v714_v23, %v680_v24  ;;  %v713_v32 = vld [vmem:[%s944_s8 + $0x44] sm:$0xf0]  ;;  %v672_v34 = vld [vmem:[%s944_s8 + $0x48] sm:$0xf0] }
  0x3b   : > { %439 = vmatpush.bf16.msra.mxu0 %v433_v25  ;;  %v436_v26 = vsel %vm431_vm1, %v691_v21, 0  ;;  %v670_v31 = vld [vmem:[%s944_s8 + $0x40] sm:$0xf]  ;;  %356 = vperm.xlu0 %781, %v353_v29   ;;  %v712_v33 = vld [vmem:[%s944_s8 + $0x44] sm:$0xf]  ;;  %vm427_vm2 = vcmask 883712  }
  0x3c   : > { %452 = vmatpush.bf16.msra.mxu1 %v436_v26  ;;  %v671_v35 = vor.u32 %v713_v32, %v670_v31  ;;  %v675_v36 = vor.u32 %v712_v33, %v672_v34  ;;  %v662_v37 = vld [vmem:[%s944_s8 + $0x30] sm:$0xf]  ;;  %v711_v38 = vld [vmem:[%s944_s8 + $0x34] sm:$0xf0]  ;;  %v710_v39 = vld [vmem:[%s944_s8 + $0x34] sm:$0xf] }
  0x3d   : > { %v664_v40 = vld [vmem:[%s944_s8 + $0x38] sm:$0xf0]  ;;  %v663_v41 = vor.u32 %v711_v38, %v662_v37  ;;  %v654_v43 = vld [vmem:[%s944_s8 + $0x20] sm:$0xf]  ;;  %v709_v44 = vld [vmem:[%s944_s8 + $0x24] sm:$0xf0] }
  0x3e   : > { %v667_v42 = vor.u32 %v710_v39, %v664_v40  ;;  %v708_v45 = vld [vmem:[%s944_s8 + $0x24] sm:$0xf]  ;;  %v656_v46 = vld [vmem:[%s944_s8 + $0x28] sm:$0xf0]  ;;  %v655_v47 = vor.u32 %v709_v44, %v654_v43  ;;  %v646_v49 = vld [vmem:[%s944_s8 + $0x10] sm:$0xf] }
  0x3f   : > { %440 = vmatpush.bf16.msra.mxu0 %v679_v27  ;;  %v659_v48 = vor.u32 %v708_v45, %v656_v46  ;;  %v707_v50 = vld [vmem:[%s944_s8 + $0x14] sm:$0xf0]  ;;  %v706_v51 = vld [vmem:[%s944_s8 + $0x14] sm:$0xf]  ;;  %v648_v52 = vld [vmem:[%s944_s8 + $0x18] sm:$0xf0] }
  0x40   : > { %453 = vmatpush.bf16.msra.mxu1 %v683_v30  ;;  %v647_v53 = vor.u32 %v707_v50, %v646_v49  ;;  %v651_v54 = vor.u32 %v706_v51, %v648_v52  ;;  %v638_v55 = vld [vmem:[%s944_s8] sm:$0xf]  ;;  %v705_v56 = vld [vmem:[%s944_s8 + $0x4] sm:$0xf0]  ;;  %v704_v57 = vld [vmem:[%s944_s8 + $0x4] sm:$0xf] }
  0x41   : > { %v640_v58 = vld [vmem:[%s944_s8 + $0x8] sm:$0xf0]  ;;  %v639_v59 = vor.u32 %v705_v56, %v638_v55  ;;  %v338_v61 = vld [vmem:[%s1020_s1] sm:$0xf]  ;;  %s718_s11 = sshll.u32 %s823_s20, 4  ;;  %vm474_vm3 = vcmask 7168  }
  0x42   : > { %v643_v60 = vor.u32 %v704_v57, %v640_v58  ;;  %s466_s12 = scalar_lea.vmem %s942_s7, %s718_s11  ;;  %v469_v9 = vld [vmem:[#allocation2] sm:$0xff]  ;;  %v476_v11 = vld [vmem:[#allocation3] sm:$0xff]  ;;  %p696_p12 = scmp.ne.s32.totalorder %s823_s20, 1 }
  0x43   : > { %441 = vmatpush.bf16.msra.mxu0 %v671_v35 }
  0x44   : > { %454 = vmatpush.bf16.msra.mxu1 %v675_v36 }
  0x47   : > { %442 = vmatpush.bf16.msra.mxu0 %v663_v41 }
  0x48   : > { %455 = vmatpush.bf16.msra.mxu1 %v667_v42 }
  0x4b   : > { %443 = vmatpush.bf16.msra.mxu0 %v655_v47 }
  0x4c   : > { %456 = vmatpush.bf16.msra.mxu1 %v659_v48 }
  0x4f   : > { %444 = vmatpush.bf16.msra.mxu0 %v647_v53 }
  0x50   : > { %457 = vmatpush.bf16.msra.mxu1 %v651_v54 }
  0x53   : > { %445 = vmatpush.bf16.msra.mxu0 %v639_v59 }
  0x54   : > { %458 = vmatpush.bf16.msra.mxu1 %v643_v60 }
  0x56   : > { %692 = vmatmul.msk.bf16.vlgmr.msra.gmra.mxu0 %vm427_vm2, %v338_v61 }
  0x57   : > { %693 = vmatmul.msk.bf16.vlgmr.msra.gmra.mxu1 %vm427_vm2, %v338_v61 }
  0xad   : > { %v357_v62 = vpop.permute.xlu0 %356 }
  0xd3   : > { %v447_v63 = vpop.f32.mrf.mxu0 }
  0xd4   : > { %v448_v0 = vadd.f32 %v447_v63, %v357_v62  ;;  %v460_v1 = vpop.f32.mrf.mxu1 }
  0xd5   : > { %v461_v2 = vadd.f32 %v460_v1, %v357_v62 }
  0xd6   : > { %467 = vst [vmem:[%s466_s12] sm:$0xff] %v448_v0  ;;  %v477_v3 = vmul.f32 %v448_v0, %v448_v0 }
  0xd7   : > { %468 = vst [vmem:[%s466_s12 + $0x8] sm:$0xff] %v461_v2  ;;  %v470_v4 = vadd.f32 %v461_v2, %v448_v0  ;;  %v478_v5 = vmul.f32 %v461_v2, %v461_v2 }
  0xd9   : > { %471 = vadd.xlane.f32.xlu0 %v470_v4  ;;  %v479_v6 = vadd.f32 %v478_v5, %v477_v3 }
  0xdb   : > { %480 = vadd.xlane.f32.xlu1 %v479_v6  ;;  %v449_v7 = vpop.f32.mrf.mxu0 }
  0xdc   : > { %v462_v8 = vpop.f32.mrf.mxu1 }
 0x14c   : > { %v472_v10 = vpop.xlane.xlu0 %471 }
 0x14d   : > { %v473_v12 = vadd.f32 %v472_v10, %v469_v9  ;;  %487 = sbr.rel (%p696_p12) target bundleno = 503 (0x1f7), region = 86 }
 0x14e   : > { %v481_v13 = vpop.xlane.xlu1 %480 }
 0x14f   : > { %475 = vst.msk [vmem:[#allocation2] sm:$0xff] %vm474_vm3, %v473_v12  ;;  %v482_v14 = vadd.f32 %v481_v13, %v476_v11 }
 0x151   : > { %483 = vst.msk [vmem:[#allocation3] sm:$0xff] %vm474_vm3, %v482_v14 }
 0x152   : > { %v843_v17 = vmov 0   ;;  %v505_v29 = vld [vmem:[%s1022_s3] sm:$0xff]  ;;  %v511_v37 = vld [vmem:[%s942_s7 + $0x8] sm:$0xff]  ;;  %v697_v38 = vld [vmem:[%s942_s7 + $0x10] sm:$0xff] }
 0x153   : > { %782 = vset.pattern.permute.xlu0 %v843_v17  ;;  %v507_v33 = vld [vmem:[%s1023_s4] sm:$0xff]  ;;  %v698_v39 = vld [vmem:[%s942_s7 + $0x18] sm:$0xff] }
 0x154   : > { %v510_v36 = vld [vmem:[%s942_s7] sm:$0xff] }
 0x156   : > { %v488_v15 = vld [vmem:[#allocation2] sm:$0xff] }
 0x157   : > { %v489_v18 = vmul.f32 0.001953125, %v488_v15 }
 0x158   : > { %v490_v16 = vld [vmem:[#allocation3] sm:$0xff] }
 0x159   : > { %v491_v19 = vmul.f32 0.001953125, %v490_v16  ;;  %v492_v20 = vmul.f32 %v489_v18, %v489_v18 }
 0x15b   : > { %v493_v21 = vsub.f32 %v491_v19, %v492_v20 }
 0x15d   : > { %v494_v22 = vadd.f32 1e-05, %v493_v21 }
 0x15f   : > { %783 = vrsqrt.f32 %v494_v22  ;;  %vm501_vm4 = vweird.f32 %v494_v22 }
 0x165   : > { %v784_v23 = vpop.eup %783 }
 0x166   : > { %v496_v24 = vmul.f32 %v784_v23, %v494_v22  ;;  %vm502_vm5 = vweird.f32 %v784_v23 }
 0x167   : > { %vm503_vm6 = vmor %vm501_vm4, %vm502_vm5 }
 0x168   : > { %v497_v25 = vmul.f32 %v784_v23, %v496_v24 }
 0x16a   : > { %v498_v26 = vmul.f32 0.5, %v497_v25 }
 0x16c   : > { %v499_v27 = vsub.f32 1.5, %v498_v26 }
 0x16e   : > { %v500_v28 = vmul.f32 %v784_v23, %v499_v27 }
 0x170   : > { %v504_v30 = vsel %vm503_vm6, %v784_v23, %v500_v28 }
 0x171   : > { %v506_v31 = vmul.f32 %v505_v29, %v504_v30 }
 0x173   : > { %514 = vperm.xlu0 %782, %v506_v31   ;;  %v508_v32 = vmul.f32 %v506_v31, %v489_v18 }
 0x175   : > { %v509_v34 = vsub.f32 %v507_v33, %v508_v32 }
 0x17b   : > { %521 = vperm.xlu0 %782, %v509_v34  }
 0x1e5   : > { %v515_v35 = vpop.permute.xlu0 %514 }
 0x1e6   : > { %v517_v40 = vmul.f32 %v515_v35, %v510_v36  ;;  %v518_v41 = vmul.f32 %v515_v35, %v511_v37  ;;  %v537_v42 = vmul.f32 %v697_v38, %v515_v35  ;;  %v538_v43 = vmul.f32 %v698_v39, %v515_v35 }
 0x1ed   : > { %v522_v44 = vpop.permute.xlu0 %521 }
 0x1ee   : > { %v524_v45 = vadd.f32 %v522_v44, %v517_v40  ;;  %v525_v46 = vadd.f32 %v522_v44, %v518_v41  ;;  %v539_v47 = vadd.f32 %v537_v42, %v522_v44  ;;  %v540_v48 = vadd.f32 %v538_v43, %v522_v44 }
 0x1f0   : > { %vm526_vm7 = vcmp.ge.f32.partialorder %v524_v45, 0.0  ;;  %vm527_vm8 = vcmp.ge.f32.partialorder %v525_v46, 0.0  ;;  %v528_v49 = vmul.f32 0.01, %v524_v45  ;;  %v529_v50 = vmul.f32 0.01, %v525_v46 }
 0x1f1   : > { %vm541_vm9 = vcmp.ge.f32.partialorder %v539_v47, 0.0  ;;  %vm542_vm10 = vcmp.ge.f32.partialorder %v540_v48, 0.0  ;;  %v543_v51 = vmul.f32 0.01, %v539_v47  ;;  %v544_v52 = vmul.f32 0.01, %v540_v48 }
 0x1f2   : > { %v530_v53 = vsel %vm526_vm7, %v524_v45, %v528_v49  ;;  %v531_v54 = vsel %vm527_vm8, %v525_v46, %v529_v50 }
 0x1f3   : > { %532 = vst [vmem:[%s942_s7] sm:$0xff] %v530_v53  ;;  %v545_v55 = vsel %vm541_vm9, %v539_v47, %v543_v51  ;;  %v546_v56 = vsel %vm542_vm10, %v540_v48, %v544_v52 }
 0x1f4   : > { %533 = vst [vmem:[%s942_s7 + $0x8] sm:$0xff] %v531_v54 }
 0x1f5   : > { %699 = vst [vmem:[%s942_s7 + $0x10] sm:$0xff] %v545_v55 }
 0x1f6   : > { %700 = vst [vmem:[%s942_s7 + $0x18] sm:$0xff] %v546_v56 }
 0x1f7 PF: > { %s15_s24 = sadd.s32 1, %s839_s24   ;;  %s1025_s18 = smov %s819_s19 }
 0x1f8   : > { %p12_p13 = scmp.ge.s32.totalorder %s15_s24, 6   ;;  %s1026_s19 = smov %s925_s6 }
 0x1f9   : > { %s1027_s20 = smov %s831_s22  ;;  %s1028_s21 = smov %s835_s23 }
 0x1fa   : > { %s1029_s22 = smov %s1032_s25  ;;  %s1030_s23 = smov %s1036_s26 }
 0x1fb   :  { %14 = sbr.rel (!%p12_p13) target bundleno = 4 (0x4), region = 123 }

</bundles_post_ra>
